<compile_context>
chip_gen: v7x
topology: tpu7x:2x2x1
jax: 0.10.0
libtpu: 0.0.40
codegen_flags: <defaults>
</compile_context>

<pallas_src>
import functools
import numpy as np
import jax
import jax.numpy as jnp
from jax import lax
from jax.experimental import pallas as pl
from jax.experimental.pallas import tpu as pltpu


def _round_up(v, m):
    return (v + m - 1) // m * m


def conv_out_size(s, K, stride):
    return (s - K) // stride + 1


# ----------------------------------------------------------------------------
# Pallas kernel: one M-tile of   out = [relu](x @ w + b)
# ----------------------------------------------------------------------------
def _mm_bias_act_kernel(x_ref, w_ref, b_ref, o_ref, *, apply_relu):
    acc = jnp.dot(x_ref[...], w_ref[...], preferred_element_type=jnp.float32)
    acc = acc + b_ref[...]                     # (1, Np) broadcast, f32 epilogue
    if apply_relu:
        acc = jnp.maximum(acc, 0.0)
    o_ref[...] = acc.astype(o_ref.dtype)


def matmul_bias_act(x, w_pad, b_pad, *, n_valid, relu, out_dtype, tm=512):
    """x: (M, K_real).  w_pad: (K_pad, N_pad) pre-padded/pre-cast at init.
    b_pad: (1, N_pad) f32.  Returns (M, n_valid) in out_dtype.
    Tiled over M only (K, N are small here); K/N padding keeps blocks
    (8,128)-friendly and the output lane-dense."""
    M, k_real = x.shape
    k_pad, n_pad = w_pad.shape

    x = x.astype(w_pad.dtype)
    tm_eff = tm if M > tm else _round_up(max(M, 1), 16)
    m_pad = _round_up(M, tm_eff)
    if m_pad != M or k_pad != k_real:
        x = jnp.pad(x, ((0, m_pad - M), (0, k_pad - k_real)))

    grid_m = m_pad // tm_eff
    out = pl.pallas_call(
        functools.partial(_mm_bias_act_kernel, apply_relu=relu),
        out_shape=jax.ShapeDtypeStruct((m_pad, n_pad), out_dtype),
        grid=(grid_m,),
        in_specs=[
            pl.BlockSpec((tm_eff, k_pad), lambda i: (i, 0)),
            pl.BlockSpec((k_pad, n_pad), lambda i: (0, 0)),
            pl.BlockSpec((1, n_pad), lambda i: (0, 0)),
        ],
        out_specs=pl.BlockSpec((tm_eff, n_pad), lambda i: (i, 0)),
        compiler_params=pltpu.CompilerParams(
            dimension_semantics=("parallel",),
            vmem_limit_bytes=48 * 1024 * 1024),
    )(x, w_pad, b_pad)
    return out[:M, :n_valid]


# ----------------------------------------------------------------------------
# im2col (layout glue, plain JAX). x is NHWC; patch feature = (kh*K+kw)*Cin + c
# ----------------------------------------------------------------------------
def _im2col(x, K, stride):
    N, H, W, C = x.shape
    Ho = conv_out_size(H, K, stride)
    Wo = conv_out_size(W, K, stride)
    patches = []
    for kh in range(K):
        for kw in range(K):
            patches.append(
                x[:, kh:kh + stride * Ho:stride, kw:kw + stride * Wo:stride, :])
    cols = jnp.concatenate(patches, axis=-1)            # (N, Ho, Wo, K*K*C)
    return cols.reshape(N * Ho * Wo, K * K * C), Ho, Wo


# ----------------------------------------------------------------------------
# Synthetic deterministic params in torch layout (Conv2d: (Cout,Cin,K,K),
# Linear: (out,in)) + reference forward
# ----------------------------------------------------------------------------
def init_pixel_encoder_params(key, observation_shape, embedded_size, depth, K, stride):
    C, H, W = observation_shape
    chans = [C, depth, depth * 2, depth * 4, depth * 8]
    params = {}
    for i in range(4):
        key, k1, k2 = jax.random.split(key, 3)
        fan_in = chans[i] * K * K
        params[f"conv{i}_w"] = (jax.random.normal(
            k1, (chans[i + 1], chans[i], K, K), jnp.float32) / np.sqrt(fan_in))
        params[f"conv{i}_b"] = 0.01 * jax.random.normal(k2, (chans[i + 1],), jnp.float32)

    h, w = H, W
    for _ in range(4):
        h = conv_out_size(h, K, stride)
        w = conv_out_size(w, K, stride)
    cnn_output_size = chans[4] * h * w

    if cnn_output_size != embedded_size:
        key, k1, k2 = jax.random.split(key, 3)
        params["fc_w"] = (jax.random.normal(k1, (embedded_size, cnn_output_size),
                                            jnp.float32) / np.sqrt(cnn_output_size))
        params["fc_b"] = 0.01 * jax.random.normal(k2, (embedded_size,), jnp.float32)
    return params, cnn_output_size


def reference_forward(params, observation, observation_shape, embedded_size, K, stride):
    lead = observation.shape[:-3]
    x = observation.reshape((-1,) + tuple(observation_shape))
    for i in range(4):
        w = params[f"conv{i}_w"]
        b = params[f"conv{i}_b"]
        x = lax.conv_general_dilated(
            x, w, window_strides=(stride, stride), padding="VALID",
            dimension_numbers=("NCHW", "OIHW", "NCHW"))
        x = jnp.maximum(x + b[None, :, None, None], 0.0)
    x = x.reshape(x.shape[0], -1)
    if "fc_w" in params:
        x = x @ params["fc_w"].T + params["fc_b"]
    return x.reshape(lead + (embedded_size,))


# ----------------------------------------------------------------------------
# One-time param preparation: pre-transpose, pad to MXU/lane-friendly shapes,
# cast to the compute dtype, fold the flatten permutation into the fc weights.
# ----------------------------------------------------------------------------
def prepare_pallas_params(params, observation_shape, K, stride,
                          compute_dtype=jnp.bfloat16):
    C, H, W = observation_shape
    convs = []
    cin, h, w = C, H, W
    cout = cin
    for i in range(4):
        wt = params[f"conv{i}_w"]                       # (Cout, Cin, K, K)
        bt = params[f"conv{i}_b"]
        cout = wt.shape[0]
        k_real = cin * K * K
        k_pad = _round_up(k_real, 16)
        n_pad = _round_up(cout, 128)
        # (kh, kw, cin) -> cout ; matches the im2col feature ordering
        w_mat = jnp.transpose(wt, (2, 3, 1, 0)).reshape(k_real, cout)
        w_mat = jnp.pad(w_mat, ((0, k_pad - k_real), (0, n_pad - cout)))
        b_row = jnp.pad(bt, (0, n_pad - cout)).reshape(1, n_pad)
        convs.append({"w": w_mat.astype(compute_dtype),
                      "b": b_row.astype(jnp.float32),
                      "cout": cout})
        cin = cout
        h = conv_out_size(h, K, stride)
        w = conv_out_size(w, K, stride)

    pp = {"convs": convs, "compute_dtype": compute_dtype}
    if "fc_w" in params:
        fcw = params["fc_w"]                            # (emb, cnn_out), NCHW-flat cols
        fcb = params["fc_b"]
        emb, cnn_out = fcw.shape
        # fold the NHWC -> NCHW flatten permutation into the weight rows
        idx = np.arange(cnn_out).reshape(cout, h, w)    # torch flat index at (c, y, x)
        perm = np.transpose(idx, (1, 2, 0)).reshape(-1)  # NHWC pos j -> torch index k
        w_eff = fcw.T[jnp.asarray(perm)]                 # (cnn_out, emb), NHWC row order
        k_pad = _round_up(cnn_out, 16)
        n_pad = _round_up(emb, 128)
        w_eff = jnp.pad(w_eff, ((0, k_pad - cnn_out), (0, n_pad - emb)))
        b_row = jnp.pad(fcb, (0, n_pad - emb)).reshape(1, n_pad)
        pp["fc"] = {"w": w_eff.astype(compute_dtype),
                    "b": b_row.astype(jnp.float32),
                    "emb": emb}
    return pp


# ----------------------------------------------------------------------------
# Forward pass (Pallas path)
# ----------------------------------------------------------------------------
def pixel_encoder_forward(pp, observation, observation_shape, embedded_size, K, stride):
    lead = observation.shape[:-3]
    x = observation.reshape((-1,) + tuple(observation_shape))          # (N, C, H, W)
    x = jnp.transpose(x, (0, 2, 3, 1)).astype(pp["compute_dtype"])     # NHWC, once
    n = x.shape[0]

    for layer in pp["convs"]:
        cols, ho, wo = _im2col(x, K, stride)            # (N*Ho*Wo, K*K*Cin)
        y = matmul_bias_act(cols, layer["w"], layer["b"],
                            n_valid=layer["cout"], relu=True,
                            out_dtype=pp["compute_dtype"])
        x = y.reshape(n, ho, wo, layer["cout"])

    if "fc" in pp:
        # flatten in NHWC order; NCHW permutation already folded into fc weights
        x = x.reshape(n, -1)
        fc = pp["fc"]
        x = matmul_bias_act(x, fc["w"], fc["b"], n_valid=fc["emb"],
                            relu=False, out_dtype=jnp.float32)
    else:
        # nn.Identity() case: reproduce torch's NCHW flatten ordering exactly
        x = jnp.transpose(x, (0, 3, 1, 2)).reshape(n, -1).astype(jnp.float32)

    return x.reshape(lead + (embedded_size,))


# ----------------------------------------------------------------------------
if __name__ == "__main__":
    # small DreamerV1-style config (final conv is 3x3 so the flatten
    # permutation folding is actually exercised)
    observation_shape = (3, 64, 64)
    depth = 8
    kernel_size = 3
    stride = 2
    embedded_observation_size = 128
    batch, seq = 2, 3

    key = jax.random.PRNGKey(0)
    kp, kx = jax.random.split(key)

    params, cnn_out = init_pixel_encoder_params(
        kp, observation_shape, embedded_observation_size, depth, kernel_size, stride)

    x = jax.random.normal(kx, (batch, seq) + observation_shape, jnp.float32)

    ref = jax.block_until_ready(reference_forward(
        params, x, observation_shape, embedded_observation_size, kernel_size, stride))

    # f32 Pallas path: tight check of kernel math + layout/permutation folding.
    pp_f32 = prepare_pallas_params(params, observation_shape, kernel_size, stride,
                                   compute_dtype=jnp.float32)
    out_f32 = jax.block_until_ready(pixel_encoder_forward(
        pp_f32, x, observation_shape, embedded_observation_size, kernel_size, stride))
    np.testing.assert_allclose(np.asarray(out_f32), np.asarray(ref),
                               atol=2e-4, rtol=2e-4)

    # bf16 fast path (default): half the HBM traffic, ~2x MXU rate, f32 accum.
    pp_bf16 = prepare_pallas_params(params, observation_shape, kernel_size, stride,
                                    compute_dtype=jnp.bfloat16)
    out = jax.block_until_ready(pixel_encoder_forward(
        pp_bf16, x, observation_shape, embedded_observation_size, kernel_size, stride))
    assert out.shape == (batch, seq, embedded_observation_size)
    np.testing.assert_allclose(np.asarray(out), np.asarray(ref),
                               atol=5e-2, rtol=5e-2)

    print("KERNEL_OK")
</pallas_src>

<mosaic_0001>
module attributes {stable_mosaic.version = 11 : i64} {
  func.func @_mm_bias_act_kernel(%arg0: i32, %arg1: memref<512x32xf32, #tpu.memory_space<vmem>>, %arg2: memref<32x128xf32, #tpu.memory_space<vmem>>, %arg3: memref<1x128xf32, #tpu.memory_space<vmem>>, %arg4: memref<512x128xf32, #tpu.memory_space<vmem>>) attributes {dimension_semantics = [#tpu.dimension_semantics<parallel>], iteration_bounds = array<i64: 12>, scalar_prefetch = 0 : i64, scratch_operands = 0 : i64, tpu.core_type = #tpu.core_type<tc>, window_params = [{transform_indices = @transform_0, window_bounds = array<i64: 512, 32>}, {pipeline_mode = #tpu.pipeline_mode<synchronous>, transform_indices = @transform_1, window_bounds = array<i64: 32, 128>}, {pipeline_mode = #tpu.pipeline_mode<synchronous>, transform_indices = @transform_2, window_bounds = array<i64: 1, 128>}, {transform_indices = @transform_3, window_bounds = array<i64: 512, 128>}]} {
    %c0 = arith.constant 0 : index
    %c0_0 = arith.constant 0 : index
    %0 = vector.load %arg1[%c0, %c0_0] : memref<512x32xf32, #tpu.memory_space<vmem>>, vector<512x32xf32>
    %c0_1 = arith.constant 0 : index
    %c0_2 = arith.constant 0 : index
    %1 = vector.load %arg2[%c0_1, %c0_2] : memref<32x128xf32, #tpu.memory_space<vmem>>, vector<32x128xf32>
    %cst = arith.constant dense<0.000000e+00> : vector<512x128xf32>
    %2 = tpu.matmul %0, %1, %cst {dimension_numbers = #tpu.dot_dimension_numbers<[1], [0], [0], [1], [0, 0, 1, 1], [], []>} : vector<512x32xf32>, vector<32x128xf32>, vector<512x128xf32> -> vector<512x128xf32>
    %c0_3 = arith.constant 0 : index
    %c0_4 = arith.constant 0 : index
    %3 = vector.load %arg3[%c0_3, %c0_4] : memref<1x128xf32, #tpu.memory_space<vmem>>, vector<1x128xf32>
    %4 = vector.broadcast %3 : vector<1x128xf32> to vector<512x128xf32>
    %5 = arith.addf %2, %4 : vector<512x128xf32>
    %cst_5 = arith.constant 0.000000e+00 : f32
    %6 = vector.broadcast %cst_5 : f32 to vector<512x128xf32>
    %7 = arith.maximumf %5, %6 : vector<512x128xf32>
    %c0_6 = arith.constant 0 : index
    %c0_7 = arith.constant 0 : index
    %8 = vector.load %arg4[%c0_6, %c0_7] : memref<512x128xf32, #tpu.memory_space<vmem>>, vector<512x128xf32>
    tpu.vector_store %arg4[%c0_6, %c0_7], %7 {strides = array<i32>} : memref<512x128xf32, #tpu.memory_space<vmem>>, vector<512x128xf32>,
    return
  }
  func.func @transform_0(%arg0: i32) -> (i32, i32) {
    %c0_i32 = arith.constant 0 : i32
    %c0_i32_0 = arith.constant 0 : i32
    return %arg0, %c0_i32 : i32, i32
  }
  func.func @transform_1(%arg0: i32) -> (i32, i32) {
    %c0_i32 = arith.constant 0 : i32
    %c0_i32_0 = arith.constant 0 : i32
    %c0_i32_1 = arith.constant 0 : i32
    return %c0_i32, %c0_i32_0 : i32, i32
  }
  func.func @transform_2(%arg0: i32) -> (i32, i32) {
    %c0_i32 = arith.constant 0 : i32
    %c0_i32_0 = arith.constant 0 : i32
    %c0_i32_1 = arith.constant 0 : i32
    return %c0_i32, %c0_i32_0 : i32, i32
  }
  func.func @transform_3(%arg0: i32) -> (i32, i32) {
    %c0_i32 = arith.constant 0 : i32
    %c0_i32_0 = arith.constant 0 : i32
    return %arg0, %c0_i32 : i32, i32
  }
}

</mosaic_0001>

<bundles_post_ra>
// kernel: tpu_custom_call.1
= control target key start
LH: loop header
LB: loop body
LE: loop exit
PB: predicated region body
PF: predicated region fallthrough
CT: control target
= control target key end

     0   :  { %8 = vsyncpa [#allocation3], 0  ;;  %s1803_s0 = inlined_call_operand.vmem [shape: f32[6144,32], index: 0, kind: input, shape index: {}]   ;;  %s1804_s1 = inlined_call_operand.vmem [shape: f32[32,128], index: 1, kind: input, shape index: {}]   ;;  %s1805_s2 = inlined_call_operand.vmem [shape: f32[1,128], index: 2, kind: input, shape index: {}]   ;;  %s1806_s3 = inlined_call_operand.hbm [shape: f32[6144,128], index: 3, kind: output, shape index: {}]  }
   0x1   :  { %10 = vsyncpa [#allocation3 + $0x1], 0  ;;  %s1419_s12 = smov 0   ;;  %s1421_s13 = smov 0  }
   0x2   :  { %s1423_s14 = smov 0   ;;  %s1425_s15 = smov 0  }
   0x3 LB: > { %s1440_s16 = sadd.s32 4294967295, %s1394_s15   ;;  %s1029_s17 = sadd.s32 4294967294, %s1394_s15   ;;  %s1394_s15 = sphi %s1425_s15, %s1812_s15   ;;  %s1390_s14 = sphi %s1423_s14, %s1811_s14   ;;  %s1386_s13 = sphi %s1421_s13, %s1810_s13   ;;  %s1382_s12 = sphi %s1419_s12, %s1809_s12  }
   0x4   : > { %s1444_s18 = sadd.s32 1, %s1394_s15   ;;  %s91_s19 = sadd.s32 1, %s1390_s14 }
   0x5   : > { %s88_s20 = ssub.s32 %s1394_s15, %s1444_s18  ;;  %p101_p0 = scmp.ne.s32.totalorder %s1390_s14, %s1386_s13 }
   0x6   : > { %p89_p1 = scmp.eq.s32.totalorder %s88_s20, 0  ;;  %p102_p2 = scmp.eq.s32.totalorder %s1440_s16, 11 }
   0x7   : > { %p107_p3 = scmp.ne.s32.totalorder %s1386_s13, %s1382_s12  ;;  %p108_p4 = scmp.eq.s32.totalorder %s1029_s17, 11 }
   0x8   : > { %s1455_s21 = scalar_select %p89_p1, %s1390_s14, %s91_s19  }
   0x9   : > { %p1457_p5 = por %p102_p2, %p101_p0  ;;  %p1461_p6 = por %p108_p4, %p107_p3 }
   0xa   : > { %p1032_p7 = scmp.ge.s32.totalorder %s1394_s15, 1  ;;  %p141_p8 = scmp.lt.s32.totalorder %s1394_s15, 13 }
   0xc   : > { %p142_p9 = pnand %p1032_p7, %p141_p8 }
   0xd   : > { %v236_v0 = vld [vmem:[%s1804_s1] sm:$0xff] (!%p142_p9)  ;;  %v237_v1 = vld [vmem:[%s1804_s1 + $0x8] sm:$0xff] (!%p142_p9)  ;;  %v238_v2 = vld [vmem:[%s1804_s1 + $0x10] sm:$0xff] (!%p142_p9)  ;;  %s1034_s30 = sshll.u32 (!%p142_p9), %s1440_s16, 6  ;;  %vm247_vm0 = vcmask (!%p142_p9), 261120   ;;  %s162_s10 = sand.u32 (!%p142_p9), 1, %s1386_s13  }
   0xe   : > { %145 = sbr.rel (%p142_p9) target bundleno = 319 (0x13f), region = 32  ;;  %v1279_v3 = vpack.c.bf16 (!%p142_p9), %v237_v1, %v236_v0  ;;  %v239_v4 = vld [vmem:[%s1804_s1 + $0x18] sm:$0xff] (!%p142_p9)  ;;  %p166_p10 = scmp.lt.s32.totalorder (!%p142_p9), %s1034_s30, 767 }
   0xf   : > { %v1283_v5 = vpack.c.bf16 (!%p142_p9), %v239_v4, %v238_v2  ;;  %s1033_s19 = sshll.u32 (!%p142_p9), %s162_s10, 9  ;;  %s1106_s24 = sshll.u32 (!%p142_p9), %s1440_s16, 13 }
  0x10   : > { %1280 = vmatprep.subr.bf16.mxu0 (!%p142_p9), %v1279_v3  ;;  %1287 = vmatprep.subr.bf16.mxu1 (!%p142_p9), %v1279_v3  ;;  %s1625_s20 = scalar_lea.vmem (!%p142_p9), [#allocation2], %s1033_s19  ;;  %s1752_s27 = scalar_lea.hbm (!%p142_p9), %s1806_s3, %s1106_s24 }
  0x11   : > { %1282 = vmatpush3.bf16.msra.mxu0 (!%p142_p9), %v1279_v3  ;;  %1289 = vmatpush3.bf16.msra.mxu1 (!%p142_p9), %v1279_v3  ;;  %s967_s25 = sshll.u32 (!%p142_p9), %s1625_s20, 4  ;;  %s1762_s28 = scalar_lea.sflag (!%p142_p9), [#allocation3], %s162_s10  ;;  %s1754_s25 = int_to_ptr.vmem [resolvable:$true] %s967_s25 }
  0x12   : > { %1284 = vmatprep.subr.bf16.mxu0 (!%p142_p9), %v1283_v5  ;;  %1288 = vmatprep.subr.bf16.mxu1 (!%p142_p9), %v1283_v5  ;;  %s1332_s29 = scalar_lea.vmem (!%p142_p9), %s1754_s25, 8192 }
  0x13   : > { %p1333_p11 = scmp.ne.s32.totalorder (!%p142_p9), %s1754_s25, %s1332_s29 }
  0x15   : > { %s1814_s30 = smov (!%p166_p10, %s1034_s30), 767  ;;  %1286 = vmatpush3.bf16.msra.mxu0 %v1283_v5  ;;  %1290 = vmatpush3.bf16.msra.mxu1 %v1283_v5  ;;  %p1334_p12 = pnand %p1333_p11, %p1457_p5 }
  0x16   : > { %s1035_s6 = sshll.u32 %s1814_s30, 3  ;;  %s1396_s30 = smov [#allocation2]  }
  0x17   : > { %s1483_s9 = scalar_lea.vmem %s1803_s0, %s1035_s6  ;;  %p1335_p13 = pneg %p1334_p12 }
  0x18   : > { %v172_v6 = vld [vmem:[%s1483_s9] sm:$0xff]  ;;  %v173_v8 = vld [vmem:[%s1483_s9 + $0x8] sm:$0xff]  ;;  %v174_v10 = vld [vmem:[%s1483_s9 + $0x10] sm:$0xff]  ;;  %s1336_s4 = sshll.u32 %s1396_s30, 4  ;;  %s1337_s4 = int_to_ptr.vmem [resolvable:$false] %s1336_s4 }
  0x19   : > { %v204_v7 = vld [vmem:[%s1483_s9 + $0x100] sm:$0xff]  ;;  %v205_v9 = vld [vmem:[%s1483_s9 + $0x108] sm:$0xff]  ;;  %1183 = vmatprep.mubr.msk.f32.mxu0 %vm247_vm0, %v172_v6  ;;  %v206_v11 = vld [vmem:[%s1483_s9 + $0x110] sm:$0xff]  ;;  %s1338_s5 = scalar_lea.vmem %s1337_s4, 16384  ;;  %p1339_p0 = scmp.lt.s32.totalorder %s1754_s25, %s1337_s4 }
  0x1a   : > { %1231 = vmatprep.mubr.msk.f32.mxu1 %vm247_vm0, %v204_v7  ;;  %1184 = vmatmul.mubr.msk.f32.vlgmr.msra.gmra.mrb[0].mxu0 %vm247_vm0, %v173_v8  ;;  %v175_v12 = vld [vmem:[%s1483_s9 + $0x18] sm:$0xff]  ;;  %v176_v14 = vld [vmem:[%s1483_s9 + $0x20] sm:$0xff]  ;;  %v177_v16 = vld [vmem:[%s1483_s9 + $0x28] sm:$0xff]  ;;  %p1340_p1 = scmp.lt.s32.totalorder %s1338_s5, %s1332_s29 }
  0x1b   : > { %1232 = vmatmul.mubr.msk.f32.vlgmr.msra.gmra.mrb[0].mxu1 %vm247_vm0, %v205_v9  ;;  %1186 = vmatprep.mubr.msk.f32.mxu0 %vm247_vm0, %v174_v10  ;;  %v207_v13 = vld [vmem:[%s1483_s9 + $0x118] sm:$0xff]  ;;  %v208_v15 = vld [vmem:[%s1483_s9 + $0x120] sm:$0xff]  ;;  %v209_v17 = vld [vmem:[%s1483_s9 + $0x128] sm:$0xff] }
  0x1c   : > { %1234 = vmatprep.mubr.msk.f32.mxu1 %vm247_vm0, %v206_v11  ;;  %v178_v18 = vld [vmem:[%s1483_s9 + $0x30] sm:$0xff]  ;;  %v179_v20 = vld [vmem:[%s1483_s9 + $0x38] sm:$0xff]  ;;  %v180_v22 = vld [vmem:[%s1483_s9 + $0x40] sm:$0xff]  ;;  %p1341_p2 = por %p1340_p1, %p1339_p0 }
  0x1d   : > { %v210_v19 = vld [vmem:[%s1483_s9 + $0x130] sm:$0xff]  ;;  %v211_v21 = vld [vmem:[%s1483_s9 + $0x138] sm:$0xff]  ;;  %v212_v23 = vld [vmem:[%s1483_s9 + $0x140] sm:$0xff] }
  0x1e   : > { %1187 = vmatmul.mubr.msk.f32.gmra.mrb[2].mxu0 %vm247_vm0, %v175_v12  ;;  %v181_v24 = vld [vmem:[%s1483_s9 + $0x48] sm:$0xff]  ;;  %v182_v26 = vld [vmem:[%s1483_s9 + $0x50] sm:$0xff]  ;;  %v183_v28 = vld [vmem:[%s1483_s9 + $0x58] sm:$0xff]  ;;  %p1342_p3 = pnand %p1341_p2, %p1335_p13 }
  0x1f   : > { %1235 = vmatmul.mubr.msk.f32.gmra.mrb[2].mxu1 %vm247_vm0, %v207_v13  ;;  %1189 = vmatprep.mubr.msk.f32.mxu0 %vm247_vm0, %v176_v14  ;;  %v213_v25 = vld [vmem:[%s1483_s9 + $0x148] sm:$0xff]  ;;  %v214_v27 = vld [vmem:[%s1483_s9 + $0x150] sm:$0xff]  ;;  %v215_v29 = vld [vmem:[%s1483_s9 + $0x158] sm:$0xff] }
  0x20   : > { %1237 = vmatprep.mubr.msk.f32.mxu1 %vm247_vm0, %v208_v15  ;;  %v184_v30 = vld [vmem:[%s1483_s9 + $0x60] sm:$0xff]  ;;  %v185_v32 = vld [vmem:[%s1483_s9 + $0x68] sm:$0xff]  ;;  %v186_v34 = vld [vmem:[%s1483_s9 + $0x70] sm:$0xff] }
  0x21   : > { %v216_v31 = vld [vmem:[%s1483_s9 + $0x160] sm:$0xff]  ;;  %v217_v33 = vld [vmem:[%s1483_s9 + $0x168] sm:$0xff]  ;;  %v218_v35 = vld [vmem:[%s1483_s9 + $0x170] sm:$0xff] }
  0x22   : > { %1190 = vmatmul.mubr.msk.f32.gmra.mrb[4].mxu0 %vm247_vm0, %v177_v16  ;;  %v187_v36 = vld [vmem:[%s1483_s9 + $0x78] sm:$0xff]  ;;  %v188_v38 = vld [vmem:[%s1483_s9 + $0x80] sm:$0xff]  ;;  %v189_v40 = vld [vmem:[%s1483_s9 + $0x88] sm:$0xff] }
  0x23   : > { %1238 = vmatmul.mubr.msk.f32.gmra.mrb[4].mxu1 %vm247_vm0, %v209_v17  ;;  %1192 = vmatprep.mubr.msk.f32.mxu0 %vm247_vm0, %v178_v18  ;;  %v219_v37 = vld [vmem:[%s1483_s9 + $0x178] sm:$0xff]  ;;  %v220_v39 = vld [vmem:[%s1483_s9 + $0x180] sm:$0xff]  ;;  %v221_v41 = vld [vmem:[%s1483_s9 + $0x188] sm:$0xff] }
  0x24   : > { %1240 = vmatprep.mubr.msk.f32.mxu1 %vm247_vm0, %v210_v19  ;;  %v190_v42 = vld [vmem:[%s1483_s9 + $0x90] sm:$0xff]  ;;  %v191_v44 = vld [vmem:[%s1483_s9 + $0x98] sm:$0xff]  ;;  %v192_v46 = vld [vmem:[%s1483_s9 + $0xa0] sm:$0xff] }
  0x25   : > { %v222_v43 = vld [vmem:[%s1483_s9 + $0x190] sm:$0xff]  ;;  %v223_v45 = vld [vmem:[%s1483_s9 + $0x198] sm:$0xff]  ;;  %v224_v47 = vld [vmem:[%s1483_s9 + $0x1a0] sm:$0xff] }
  0x26   : > { %1193 = vmatmul.mubr.msk.f32.gmra.mrb[6].mxu0 %vm247_vm0, %v179_v20  ;;  %v193_v48 = vld [vmem:[%s1483_s9 + $0xa8] sm:$0xff]  ;;  %v194_v50 = vld [vmem:[%s1483_s9 + $0xb0] sm:$0xff]  ;;  %v195_v52 = vld [vmem:[%s1483_s9 + $0xb8] sm:$0xff] }
  0x27   : > { %1241 = vmatmul.mubr.msk.f32.gmra.mrb[6].mxu1 %vm247_vm0, %v211_v21  ;;  %1195 = vmatprep.mubr.msk.f32.mxu0 %vm247_vm0, %v180_v22  ;;  %v225_v49 = vld [vmem:[%s1483_s9 + $0x1a8] sm:$0xff]  ;;  %v226_v51 = vld [vmem:[%s1483_s9 + $0x1b0] sm:$0xff]  ;;  %v227_v53 = vld [vmem:[%s1483_s9 + $0x1b8] sm:$0xff] }
  0x28   : > { %1243 = vmatprep.mubr.msk.f32.mxu1 %vm247_vm0, %v212_v23  ;;  %v196_v54 = vld [vmem:[%s1483_s9 + $0xc0] sm:$0xff]  ;;  %v197_v56 = vld [vmem:[%s1483_s9 + $0xc8] sm:$0xff]  ;;  %v198_v58 = vld [vmem:[%s1483_s9 + $0xd0] sm:$0xff] }
  0x29   : > { %v228_v55 = vld [vmem:[%s1483_s9 + $0x1c0] sm:$0xff]  ;;  %v229_v57 = vld [vmem:[%s1483_s9 + $0x1c8] sm:$0xff]  ;;  %v230_v59 = vld [vmem:[%s1483_s9 + $0x1d0] sm:$0xff] }
  0x2a   : > { %1196 = vmatmul.mubr.msk.f32.gmra.mrb[8].mxu0 %vm247_vm0, %v181_v24  ;;  %v199_v60 = vld [vmem:[%s1483_s9 + $0xd8] sm:$0xff]  ;;  %v200_v62 = vld [vmem:[%s1483_s9 + $0xe0] sm:$0xff]  ;;  %v201_v0 = vld [vmem:[%s1483_s9 + $0xe8] sm:$0xff] }
  0x2b   : > { %1244 = vmatmul.mubr.msk.f32.gmra.mrb[8].mxu1 %vm247_vm0, %v213_v25  ;;  %1198 = vmatprep.mubr.msk.f32.mxu0 %vm247_vm0, %v182_v26  ;;  %v231_v61 = vld [vmem:[%s1483_s9 + $0x1d8] sm:$0xff]  ;;  %v232_v63 = vld [vmem:[%s1483_s9 + $0x1e0] sm:$0xff]  ;;  %v233_v1 = vld [vmem:[%s1483_s9 + $0x1e8] sm:$0xff] }
  0x2c   : > { %1246 = vmatprep.mubr.msk.f32.mxu1 %vm247_vm0, %v214_v27  ;;  %v202_v2 = vld [vmem:[%s1483_s9 + $0xf0] sm:$0xff]  ;;  %v203_v4 = vld [vmem:[%s1483_s9 + $0xf8] sm:$0xff]  ;;  %v1617_v6 = vld [vmem:[%s1805_s2] ss:$0 sm:$0xff] }
  0x2d   : > { %v234_v3 = vld [vmem:[%s1483_s9 + $0x1f0] sm:$0xff]  ;;  %v235_v5 = vld [vmem:[%s1483_s9 + $0x1f8] sm:$0xff] }
  0x2e   : > { %1199 = vmatmul.mubr.msk.f32.gmra.mrb[10].mxu0 %vm247_vm0, %v183_v28 }
  0x2f   : > { %1247 = vmatmul.mubr.msk.f32.gmra.mrb[10].mxu1 %vm247_vm0, %v215_v29  ;;  %1201 = vmatprep.mubr.msk.f32.mxu0 %vm247_vm0, %v184_v30 }
  0x30   : > { %1249 = vmatprep.mubr.msk.f32.mxu1 %vm247_vm0, %v216_v31 }
  0x32   : > { %1202 = vmatmul.mubr.msk.f32.gmra.mrb[12].mxu0 %vm247_vm0, %v185_v32 }
  0x33   : > { %1250 = vmatmul.mubr.msk.f32.gmra.mrb[12].mxu1 %vm247_vm0, %v217_v33  ;;  %1204 = vmatprep.mubr.msk.f32.mxu0 %vm247_vm0, %v186_v34 }
  0x34   : > { %1252 = vmatprep.mubr.msk.f32.mxu1 %vm247_vm0, %v218_v35 }
  0x36   : > { %1205 = vmatmul.mubr.msk.f32.gmra.mrb[14].mxu0 %vm247_vm0, %v187_v36 }
  0x37   : > { %1253 = vmatmul.mubr.msk.f32.gmra.mrb[14].mxu1 %vm247_vm0, %v219_v37  ;;  %1207 = vmatprep.mubr.msk.f32.mxu0 %vm247_vm0, %v188_v38 }
  0x38   : > { %1255 = vmatprep.mubr.msk.f32.mxu1 %vm247_vm0, %v220_v39 }
  0x3a   : > { %1208 = vmatmul.mubr.msk.f32.gmra.mrb[16].mxu0 %vm247_vm0, %v189_v40 }
  0x3b   : > { %1256 = vmatmul.mubr.msk.f32.gmra.mrb[16].mxu1 %vm247_vm0, %v221_v41  ;;  %1210 = vmatprep.mubr.msk.f32.mxu0 %vm247_vm0, %v190_v42 }
  0x3c   : > { %1258 = vmatprep.mubr.msk.f32.mxu1 %vm247_vm0, %v222_v43 }
  0x3e   : > { %1211 = vmatmul.mubr.msk.f32.gmra.mrb[18].mxu0 %vm247_vm0, %v191_v44 }
  0x3f   : > { %1259 = vmatmul.mubr.msk.f32.gmra.mrb[18].mxu1 %vm247_vm0, %v223_v45  ;;  %1213 = vmatprep.mubr.msk.f32.mxu0 %vm247_vm0, %v192_v46 }
  0x40   : > { %1261 = vmatprep.mubr.msk.f32.mxu1 %vm247_vm0, %v224_v47 }
  0x42   : > { %1214 = vmatmul.mubr.msk.f32.gmra.mrb[20].mxu0 %vm247_vm0, %v193_v48 }
  0x43   : > { %1262 = vmatmul.mubr.msk.f32.gmra.mrb[20].mxu1 %vm247_vm0, %v225_v49  ;;  %1216 = vmatprep.mubr.msk.f32.mxu0 %vm247_vm0, %v194_v50 }
  0x44   : > { %1264 = vmatprep.mubr.msk.f32.mxu1 %vm247_vm0, %v226_v51 }
  0x46   : > { %1217 = vmatmul.mubr.msk.f32.gmra.mrb[22].mxu0 %vm247_vm0, %v195_v52 }
  0x47   : > { %1265 = vmatmul.mubr.msk.f32.gmra.mrb[22].mxu1 %vm247_vm0, %v227_v53  ;;  %1219 = vmatprep.mubr.msk.f32.mxu0 %vm247_vm0, %v196_v54 }
  0x48   : > { %1267 = vmatprep.mubr.msk.f32.mxu1 %vm247_vm0, %v228_v55 }
  0x4a   : > { %1220 = vmatmul.mubr.msk.f32.gmra.mrb[24].mxu0 %vm247_vm0, %v197_v56 }
  0x4b   : > { %1268 = vmatmul.mubr.msk.f32.gmra.mrb[24].mxu1 %vm247_vm0, %v229_v57  ;;  %1222 = vmatprep.mubr.msk.f32.mxu0 %vm247_vm0, %v198_v58 }
  0x4c   : > { %1270 = vmatprep.mubr.msk.f32.mxu1 %vm247_vm0, %v230_v59 }
  0x4e   : > { %1223 = vmatmul.mubr.msk.f32.gmra.mrb[26].mxu0 %vm247_vm0, %v199_v60 }
  0x4f   : > { %1271 = vmatmul.mubr.msk.f32.gmra.mrb[26].mxu1 %vm247_vm0, %v231_v61  ;;  %1225 = vmatprep.mubr.msk.f32.mxu0 %vm247_vm0, %v200_v62 }
  0x50   : > { %1273 = vmatprep.mubr.msk.f32.mxu1 %vm247_vm0, %v232_v63 }
  0x52   : > { %1226 = vmatmul.mubr.msk.f32.gmra.mrb[28].mxu0 %vm247_vm0, %v201_v0 }
  0x53   : > { %1274 = vmatmul.mubr.msk.f32.gmra.mrb[28].mxu1 %vm247_vm0, %v233_v1  ;;  %1228 = vmatprep.mubr.msk.f32.mxu0 %vm247_vm0, %v202_v2 }
  0x54   : > { %1276 = vmatprep.mubr.msk.f32.mxu1 %vm247_vm0, %v234_v3 }
  0x56   : > { %1229 = vmatmul.mubr.msk.f32.gmra.mrb[30].mxu0 %vm247_vm0, %v203_v4 }
  0x57   : > { %1277 = vmatmul.mubr.msk.f32.gmra.mrb[30].mxu1 %vm247_vm0, %v235_v5 }
  0xed   : > { %v1185_v7 = vpop.f32.mrb[0].mxu0 }
  0xee   : > { %v1233_v8 = vpop.f32.mrb[0].mxu1  ;;  %v512_v9 = vadd.f32 %v1185_v7, %v1617_v6  ;;  %v506_v11 = vpop.f32.mrb[1].mxu0 }
  0xef   : > { %v672_v10 = vadd.f32 %v1233_v8, %v1617_v6  ;;  %v666_v12 = vpop.f32.mrb[1].mxu1  ;;  %v507_v13 = vadd.f32 %v1617_v6, %v506_v11 }
  0xf0   : > { %v667_v14 = vadd.f32 %v1617_v6, %v666_v12  ;;  %v826_v15 = vmax.f32 %v512_v9, 0.0 }
  0xf1   : > { %v858_v16 = vmax.f32 %v672_v10, 0.0  ;;  %v825_v17 = vmax.f32 %v507_v13, 0.0  ;;  %v1188_v19 = vpop.f32.mrb[2].mxu0 }
  0xf2   : > { %v857_v18 = vmax.f32 %v667_v14, 0.0  ;;  %v1236_v20 = vpop.f32.mrb[2].mxu1  ;;  %890 = vst [vmem:[%s1625_s20 + $0x8] sm:$0xff] %v826_v15  ;;  %v522_v21 = vadd.f32 %v1188_v19, %v1617_v6  ;;  %v516_v23 = vpop.f32.mrb[3].mxu0 }
  0xf3   : > { %922 = vst [vmem:[%s1625_s20 + $0x108] sm:$0xff] %v858_v16  ;;  %v682_v22 = vadd.f32 %v1236_v20, %v1617_v6  ;;  %v676_v24 = vpop.f32.mrb[3].mxu1  ;;  %889 = vst [vmem:[%s1625_s20] sm:$0xff] %v825_v17  ;;  %v517_v25 = vadd.f32 %v1617_v6, %v516_v23 }
  0xf4   : > { %921 = vst [vmem:[%s1625_s20 + $0x100] sm:$0xff] %v857_v18  ;;  %v677_v26 = vadd.f32 %v1617_v6, %v676_v24  ;;  %v828_v27 = vmax.f32 %v522_v21, 0.0 }
  0xf5   : > { %v860_v28 = vmax.f32 %v682_v22, 0.0  ;;  %v827_v29 = vmax.f32 %v517_v25, 0.0  ;;  %v1191_v31 = vpop.f32.mrb[4].mxu0 }
  0xf6   : > { %v859_v30 = vmax.f32 %v677_v26, 0.0  ;;  %v1239_v32 = vpop.f32.mrb[4].mxu1  ;;  %892 = vst [vmem:[%s1625_s20 + $0x18] sm:$0xff] %v828_v27  ;;  %v532_v33 = vadd.f32 %v1191_v31, %v1617_v6  ;;  %v526_v35 = vpop.f32.mrb[5].mxu0 }
  0xf7   : > { %924 = vst [vmem:[%s1625_s20 + $0x118] sm:$0xff] %v860_v28  ;;  %v692_v34 = vadd.f32 %v1239_v32, %v1617_v6  ;;  %v686_v36 = vpop.f32.mrb[5].mxu1  ;;  %891 = vst [vmem:[%s1625_s20 + $0x10] sm:$0xff] %v827_v29  ;;  %v527_v37 = vadd.f32 %v1617_v6, %v526_v35 }
  0xf8   : > { %923 = vst [vmem:[%s1625_s20 + $0x110] sm:$0xff] %v859_v30  ;;  %v687_v38 = vadd.f32 %v1617_v6, %v686_v36  ;;  %v830_v39 = vmax.f32 %v532_v33, 0.0 }
  0xf9   : > { %v862_v40 = vmax.f32 %v692_v34, 0.0  ;;  %v829_v41 = vmax.f32 %v527_v37, 0.0  ;;  %v1194_v43 = vpop.f32.mrb[6].mxu0 }
  0xfa   : > { %v861_v42 = vmax.f32 %v687_v38, 0.0  ;;  %v1242_v44 = vpop.f32.mrb[6].mxu1  ;;  %894 = vst [vmem:[%s1625_s20 + $0x28] sm:$0xff] %v830_v39  ;;  %v542_v45 = vadd.f32 %v1194_v43, %v1617_v6  ;;  %v536_v47 = vpop.f32.mrb[7].mxu0 }
  0xfb   : > { %926 = vst [vmem:[%s1625_s20 + $0x128] sm:$0xff] %v862_v40  ;;  %v702_v46 = vadd.f32 %v1242_v44, %v1617_v6  ;;  %v696_v48 = vpop.f32.mrb[7].mxu1  ;;  %893 = vst [vmem:[%s1625_s20 + $0x20] sm:$0xff] %v829_v41  ;;  %v537_v49 = vadd.f32 %v1617_v6, %v536_v47 }
  0xfc   : > { %925 = vst [vmem:[%s1625_s20 + $0x120] sm:$0xff] %v861_v42  ;;  %v697_v50 = vadd.f32 %v1617_v6, %v696_v48  ;;  %v832_v51 = vmax.f32 %v542_v45, 0.0 }
  0xfd   : > { %v864_v52 = vmax.f32 %v702_v46, 0.0  ;;  %v831_v53 = vmax.f32 %v537_v49, 0.0  ;;  %v1197_v55 = vpop.f32.mrb[8].mxu0 }
  0xfe   : > { %v863_v54 = vmax.f32 %v697_v50, 0.0  ;;  %v1245_v56 = vpop.f32.mrb[8].mxu1  ;;  %896 = vst [vmem:[%s1625_s20 + $0x38] sm:$0xff] %v832_v51  ;;  %v552_v57 = vadd.f32 %v1197_v55, %v1617_v6  ;;  %v546_v59 = vpop.f32.mrb[9].mxu0 }
  0xff   : > { %928 = vst [vmem:[%s1625_s20 + $0x138] sm:$0xff] %v864_v52  ;;  %v712_v58 = vadd.f32 %v1245_v56, %v1617_v6  ;;  %v706_v60 = vpop.f32.mrb[9].mxu1  ;;  %895 = vst [vmem:[%s1625_s20 + $0x30] sm:$0xff] %v831_v53  ;;  %v547_v61 = vadd.f32 %v1617_v6, %v546_v59 }
 0x100   : > { %927 = vst [vmem:[%s1625_s20 + $0x130] sm:$0xff] %v863_v54  ;;  %v707_v62 = vadd.f32 %v1617_v6, %v706_v60  ;;  %v834_v63 = vmax.f32 %v552_v57, 0.0 }
 0x101   : > { %v866_v0 = vmax.f32 %v712_v58, 0.0  ;;  %v833_v1 = vmax.f32 %v547_v61, 0.0  ;;  %v1200_v3 = vpop.f32.mrb[10].mxu0 }
 0x102   : > { %v865_v2 = vmax.f32 %v707_v62, 0.0  ;;  %v1248_v4 = vpop.f32.mrb[10].mxu1  ;;  %898 = vst [vmem:[%s1625_s20 + $0x48] sm:$0xff] %v834_v63  ;;  %v562_v5 = vadd.f32 %v1200_v3, %v1617_v6  ;;  %v556_v8 = vpop.f32.mrb[11].mxu0 }
 0x103   : > { %930 = vst [vmem:[%s1625_s20 + $0x148] sm:$0xff] %v866_v0  ;;  %v722_v7 = vadd.f32 %v1248_v4, %v1617_v6  ;;  %v716_v9 = vpop.f32.mrb[11].mxu1  ;;  %897 = vst [vmem:[%s1625_s20 + $0x40] sm:$0xff] %v833_v1  ;;  %v557_v10 = vadd.f32 %v1617_v6, %v556_v8 }
 0x104   : > { %929 = vst [vmem:[%s1625_s20 + $0x140] sm:$0xff] %v865_v2  ;;  %v717_v11 = vadd.f32 %v1617_v6, %v716_v9  ;;  %v836_v12 = vmax.f32 %v562_v5, 0.0 }
 0x105   : > { %v868_v13 = vmax.f32 %v722_v7, 0.0  ;;  %v835_v14 = vmax.f32 %v557_v10, 0.0  ;;  %v1203_v16 = vpop.f32.mrb[12].mxu0 }
 0x106   : > { %v867_v15 = vmax.f32 %v717_v11, 0.0  ;;  %v1251_v17 = vpop.f32.mrb[12].mxu1  ;;  %900 = vst [vmem:[%s1625_s20 + $0x58] sm:$0xff] %v836_v12  ;;  %v572_v18 = vadd.f32 %v1203_v16, %v1617_v6  ;;  %v566_v20 = vpop.f32.mrb[13].mxu0 }
 0x107   : > { %932 = vst [vmem:[%s1625_s20 + $0x158] sm:$0xff] %v868_v13  ;;  %v732_v19 = vadd.f32 %v1251_v17, %v1617_v6  ;;  %v726_v21 = vpop.f32.mrb[13].mxu1  ;;  %899 = vst [vmem:[%s1625_s20 + $0x50] sm:$0xff] %v835_v14  ;;  %v567_v22 = vadd.f32 %v1617_v6, %v566_v20 }
 0x108   : > { %931 = vst [vmem:[%s1625_s20 + $0x150] sm:$0xff] %v867_v15  ;;  %v727_v23 = vadd.f32 %v1617_v6, %v726_v21  ;;  %v838_v24 = vmax.f32 %v572_v18, 0.0 }
 0x109   : > { %v870_v25 = vmax.f32 %v732_v19, 0.0  ;;  %v837_v26 = vmax.f32 %v567_v22, 0.0  ;;  %v1206_v28 = vpop.f32.mrb[14].mxu0 }
 0x10a   : > { %v869_v27 = vmax.f32 %v727_v23, 0.0  ;;  %v1254_v29 = vpop.f32.mrb[14].mxu1  ;;  %902 = vst [vmem:[%s1625_s20 + $0x68] sm:$0xff] %v838_v24  ;;  %v582_v30 = vadd.f32 %v1206_v28, %v1617_v6  ;;  %v576_v32 = vpop.f32.mrb[15].mxu0 }
 0x10b   : > { %934 = vst [vmem:[%s1625_s20 + $0x168] sm:$0xff] %v870_v25  ;;  %v742_v31 = vadd.f32 %v1254_v29, %v1617_v6  ;;  %v736_v33 = vpop.f32.mrb[15].mxu1  ;;  %901 = vst [vmem:[%s1625_s20 + $0x60] sm:$0xff] %v837_v26  ;;  %v577_v34 = vadd.f32 %v1617_v6, %v576_v32 }
 0x10c   : > { %933 = vst [vmem:[%s1625_s20 + $0x160] sm:$0xff] %v869_v27  ;;  %v737_v35 = vadd.f32 %v1617_v6, %v736_v33  ;;  %v840_v36 = vmax.f32 %v582_v30, 0.0 }
 0x10d   : > { %v872_v37 = vmax.f32 %v742_v31, 0.0  ;;  %v839_v38 = vmax.f32 %v577_v34, 0.0  ;;  %v1209_v40 = vpop.f32.mrb[16].mxu0 }
 0x10e   : > { %v871_v39 = vmax.f32 %v737_v35, 0.0  ;;  %v1257_v41 = vpop.f32.mrb[16].mxu1  ;;  %904 = vst [vmem:[%s1625_s20 + $0x78] sm:$0xff] %v840_v36  ;;  %v592_v42 = vadd.f32 %v1209_v40, %v1617_v6  ;;  %v586_v44 = vpop.f32.mrb[17].mxu0 }
 0x10f   : > { %936 = vst [vmem:[%s1625_s20 + $0x178] sm:$0xff] %v872_v37  ;;  %v752_v43 = vadd.f32 %v1257_v41, %v1617_v6  ;;  %v746_v45 = vpop.f32.mrb[17].mxu1  ;;  %903 = vst [vmem:[%s1625_s20 + $0x70] sm:$0xff] %v839_v38  ;;  %v587_v46 = vadd.f32 %v1617_v6, %v586_v44 }
 0x110   : > { %935 = vst [vmem:[%s1625_s20 + $0x170] sm:$0xff] %v871_v39  ;;  %v747_v47 = vadd.f32 %v1617_v6, %v746_v45  ;;  %v842_v48 = vmax.f32 %v592_v42, 0.0 }
 0x111   : > { %v874_v49 = vmax.f32 %v752_v43, 0.0  ;;  %v841_v50 = vmax.f32 %v587_v46, 0.0  ;;  %v1212_v52 = vpop.f32.mrb[18].mxu0 }
 0x112   : > { %v873_v51 = vmax.f32 %v747_v47, 0.0  ;;  %v1260_v53 = vpop.f32.mrb[18].mxu1  ;;  %906 = vst [vmem:[%s1625_s20 + $0x88] sm:$0xff] %v842_v48  ;;  %v602_v54 = vadd.f32 %v1212_v52, %v1617_v6  ;;  %v596_v56 = vpop.f32.mrb[19].mxu0 }
 0x113   : > { %938 = vst [vmem:[%s1625_s20 + $0x188] sm:$0xff] %v874_v49  ;;  %v762_v55 = vadd.f32 %v1260_v53, %v1617_v6  ;;  %v756_v57 = vpop.f32.mrb[19].mxu1  ;;  %905 = vst [vmem:[%s1625_s20 + $0x80] sm:$0xff] %v841_v50  ;;  %v597_v58 = vadd.f32 %v1617_v6, %v596_v56 }
 0x114   : > { %937 = vst [vmem:[%s1625_s20 + $0x180] sm:$0xff] %v873_v51  ;;  %v757_v59 = vadd.f32 %v1617_v6, %v756_v57  ;;  %v844_v60 = vmax.f32 %v602_v54, 0.0 }
 0x115   : > { %v876_v61 = vmax.f32 %v762_v55, 0.0  ;;  %v843_v62 = vmax.f32 %v597_v58, 0.0  ;;  %v1215_v0 = vpop.f32.mrb[20].mxu0 }
 0x116   : > { %v875_v63 = vmax.f32 %v757_v59, 0.0  ;;  %v1263_v1 = vpop.f32.mrb[20].mxu1  ;;  %908 = vst [vmem:[%s1625_s20 + $0x98] sm:$0xff] %v844_v60  ;;  %v612_v2 = vadd.f32 %v1215_v0, %v1617_v6  ;;  %v606_v4 = vpop.f32.mrb[21].mxu0 }
 0x117   : > { %940 = vst [vmem:[%s1625_s20 + $0x198] sm:$0xff] %v876_v61  ;;  %v772_v3 = vadd.f32 %v1263_v1, %v1617_v6  ;;  %v766_v5 = vpop.f32.mrb[21].mxu1  ;;  %907 = vst [vmem:[%s1625_s20 + $0x90] sm:$0xff] %v843_v62  ;;  %v607_v7 = vadd.f32 %v1617_v6, %v606_v4 }
 0x118   : > { %939 = vst [vmem:[%s1625_s20 + $0x190] sm:$0xff] %v875_v63  ;;  %v767_v8 = vadd.f32 %v1617_v6, %v766_v5  ;;  %v846_v9 = vmax.f32 %v612_v2, 0.0 }
 0x119   : > { %v878_v10 = vmax.f32 %v772_v3, 0.0  ;;  %v845_v11 = vmax.f32 %v607_v7, 0.0  ;;  %v1218_v13 = vpop.f32.mrb[22].mxu0 }
 0x11a   : > { %v877_v12 = vmax.f32 %v767_v8, 0.0  ;;  %v1266_v14 = vpop.f32.mrb[22].mxu1  ;;  %910 = vst [vmem:[%s1625_s20 + $0xa8] sm:$0xff] %v846_v9  ;;  %v622_v15 = vadd.f32 %v1218_v13, %v1617_v6  ;;  %v616_v17 = vpop.f32.mrb[23].mxu0 }
 0x11b   : > { %942 = vst [vmem:[%s1625_s20 + $0x1a8] sm:$0xff] %v878_v10  ;;  %v782_v16 = vadd.f32 %v1266_v14, %v1617_v6  ;;  %v776_v18 = vpop.f32.mrb[23].mxu1  ;;  %909 = vst [vmem:[%s1625_s20 + $0xa0] sm:$0xff] %v845_v11  ;;  %v617_v19 = vadd.f32 %v1617_v6, %v616_v17 }
 0x11c   : > { %941 = vst [vmem:[%s1625_s20 + $0x1a0] sm:$0xff] %v877_v12  ;;  %v777_v20 = vadd.f32 %v1617_v6, %v776_v18  ;;  %v848_v21 = vmax.f32 %v622_v15, 0.0 }
 0x11d   : > { %v880_v22 = vmax.f32 %v782_v16, 0.0  ;;  %v847_v23 = vmax.f32 %v617_v19, 0.0  ;;  %v1221_v25 = vpop.f32.mrb[24].mxu0 }
 0x11e   : > { %v879_v24 = vmax.f32 %v777_v20, 0.0  ;;  %v1269_v26 = vpop.f32.mrb[24].mxu1  ;;  %912 = vst [vmem:[%s1625_s20 + $0xb8] sm:$0xff] %v848_v21  ;;  %v632_v27 = vadd.f32 %v1221_v25, %v1617_v6  ;;  %v626_v29 = vpop.f32.mrb[25].mxu0 }
 0x11f   : > { %944 = vst [vmem:[%s1625_s20 + $0x1b8] sm:$0xff] %v880_v22  ;;  %v792_v28 = vadd.f32 %v1269_v26, %v1617_v6  ;;  %v786_v30 = vpop.f32.mrb[25].mxu1  ;;  %911 = vst [vmem:[%s1625_s20 + $0xb0] sm:$0xff] %v847_v23  ;;  %v627_v31 = vadd.f32 %v1617_v6, %v626_v29 }
 0x120   : > { %943 = vst [vmem:[%s1625_s20 + $0x1b0] sm:$0xff] %v879_v24  ;;  %v787_v32 = vadd.f32 %v1617_v6, %v786_v30  ;;  %v850_v33 = vmax.f32 %v632_v27, 0.0 }
 0x121   : > { %v882_v34 = vmax.f32 %v792_v28, 0.0  ;;  %v849_v35 = vmax.f32 %v627_v31, 0.0  ;;  %v1224_v37 = vpop.f32.mrb[26].mxu0 }
 0x122   : > { %v881_v36 = vmax.f32 %v787_v32, 0.0  ;;  %v1272_v38 = vpop.f32.mrb[26].mxu1  ;;  %914 = vst [vmem:[%s1625_s20 + $0xc8] sm:$0xff] %v850_v33  ;;  %v642_v39 = vadd.f32 %v1224_v37, %v1617_v6  ;;  %v636_v41 = vpop.f32.mrb[27].mxu0 }
 0x123   : > { %946 = vst [vmem:[%s1625_s20 + $0x1c8] sm:$0xff] %v882_v34  ;;  %v802_v40 = vadd.f32 %v1272_v38, %v1617_v6  ;;  %v796_v42 = vpop.f32.mrb[27].mxu1  ;;  %913 = vst [vmem:[%s1625_s20 + $0xc0] sm:$0xff] %v849_v35  ;;  %v637_v43 = vadd.f32 %v1617_v6, %v636_v41 }
 0x124   : > { %945 = vst [vmem:[%s1625_s20 + $0x1c0] sm:$0xff] %v881_v36  ;;  %v797_v44 = vadd.f32 %v1617_v6, %v796_v42  ;;  %v852_v45 = vmax.f32 %v642_v39, 0.0 }
 0x125   : > { %v884_v46 = vmax.f32 %v802_v40, 0.0  ;;  %v851_v47 = vmax.f32 %v637_v43, 0.0  ;;  %v1227_v49 = vpop.f32.mrb[28].mxu0 }
 0x126   : > { %v883_v48 = vmax.f32 %v797_v44, 0.0  ;;  %v1275_v50 = vpop.f32.mrb[28].mxu1  ;;  %916 = vst [vmem:[%s1625_s20 + $0xd8] sm:$0xff] %v852_v45  ;;  %v652_v51 = vadd.f32 %v1227_v49, %v1617_v6  ;;  %v646_v53 = vpop.f32.mrb[29].mxu0 }
 0x127   : > { %948 = vst [vmem:[%s1625_s20 + $0x1d8] sm:$0xff] %v884_v46  ;;  %v812_v52 = vadd.f32 %v1275_v50, %v1617_v6  ;;  %v806_v54 = vpop.f32.mrb[29].mxu1  ;;  %915 = vst [vmem:[%s1625_s20 + $0xd0] sm:$0xff] %v851_v47  ;;  %v647_v55 = vadd.f32 %v1617_v6, %v646_v53 }
 0x128   : > { %947 = vst [vmem:[%s1625_s20 + $0x1d0] sm:$0xff] %v883_v48  ;;  %v807_v56 = vadd.f32 %v1617_v6, %v806_v54  ;;  %v854_v57 = vmax.f32 %v652_v51, 0.0 }
 0x129   : > { %v886_v58 = vmax.f32 %v812_v52, 0.0  ;;  %v853_v59 = vmax.f32 %v647_v55, 0.0  ;;  %v1230_v61 = vpop.f32.mrb[30].mxu0 }
 0x12a   : > { %v885_v60 = vmax.f32 %v807_v56, 0.0  ;;  %v1278_v62 = vpop.f32.mrb[30].mxu1  ;;  %918 = vst [vmem:[%s1625_s20 + $0xe8] sm:$0xff] %v854_v57  ;;  %v662_v63 = vadd.f32 %v1230_v61, %v1617_v6  ;;  %v656_v1 = vpop.f32.mrb[31].mxu0 }
 0x12b   : > { %950 = vst [vmem:[%s1625_s20 + $0x1e8] sm:$0xff] %v886_v58  ;;  %v822_v0 = vadd.f32 %v1278_v62, %v1617_v6  ;;  %v816_v2 = vpop.f32.mrb[31].mxu1  ;;  %917 = vst [vmem:[%s1625_s20 + $0xe0] sm:$0xff] %v853_v59  ;;  %v657_v3 = vadd.f32 %v1617_v6, %v656_v1 }
 0x12c   : > { %949 = vst [vmem:[%s1625_s20 + $0x1e0] sm:$0xff] %v885_v60  ;;  %v817_v4 = vadd.f32 %v1617_v6, %v816_v2  ;;  %v856_v5 = vmax.f32 %v662_v63, 0.0 }
 0x12d   : > { %v888_v7 = vmax.f32 %v822_v0, 0.0  ;;  %v855_v8 = vmax.f32 %v657_v3, 0.0 }
 0x12e   : > { %v887_v9 = vmax.f32 %v817_v4, 0.0  ;;  %920 = vst [vmem:[%s1625_s20 + $0xf8] sm:$0xff] %v856_v5 }
 0x12f   : > { %952 = vst [vmem:[%s1625_s20 + $0x1f8] sm:$0xff] %v888_v7  ;;  %919 = vst [vmem:[%s1625_s20 + $0xf0] sm:$0xff] %v855_v8 }
 0x130   : > { %951 = vst [vmem:[%s1625_s20 + $0x1f0] sm:$0xff] %v887_v9 }
 0x131   : > { %1345 = shalt.err (!%p1342_p3)
}
 0x132   : > { %s1346_s6 = scalar_lea.hbm %s1752_s27, 8192  ;;  %s1350_s9 = scalar_lea.hbm %s1806_s3, 98304 }
 0x133   : > { %p1347_p4 = scmp.ne.s32.totalorder %s1752_s27, %s1346_s6  ;;  %p1351_p9 = scmp.lt.u32.totalorder %s1752_s27, %s1806_s3 }
 0x134   : > { %p1352_p10 = scmp.lt.u32.totalorder %s1350_s9, %s1346_s6  ;;  %p1354_p12 = scmp.lt.u32.totalorder %s1346_s6, %s1752_s27 }
 0x135   : > { %p1348_p7 = pnand %p1347_p4, %p1457_p5 }
 0x136   : > { %p1353_p11 = por %p1352_p10, %p1351_p9 }
 0x137   : > { %p1349_p8 = pneg %p1348_p7 }
 0x138   : > { %p1355_p13 = por %p1354_p12, %p1353_p11 }
 0x13a   : > { %p1356_p0 = pnand %p1355_p13, %p1349_p8 }
 0x13c   : > { %1359 = shalt.err (!%p1356_p0)
}
 0x13d   : > { %s1397_s17 = smov 128   ;;  %s1398_s19 = smov 8  }
 0x13e   : > { %1291 = dma.vmem_to_hbm [thread:$0]  (%p1457_p5), %s1754_s25, 8192, %s1752_s27, %s1762_s28, %s1397_s17, %s1397_s17, %s1398_s19  }
 0x13f PF: > { %p1297_p1 = scmp.ge.s32.totalorder %s1394_s15, 2  ;;  %s982_s20 = sand.u32 1, %s1382_s12  }
 0x140   : > { %s983_s24 = scalar_lea.sflag [#allocation3], %s982_s20 }
 0x141   : > { %p1294_p2 = pnand %p1297_p1, %p1461_p6 }
 0x143   : > { %1377 = dma.done.wait (!%p1294_p2), %s983_s24, 8192  }
 0x144   : > { %1379 = vsyncadd (!%p1294_p2), %s983_s24, 4294959104  ;;  %p13_p3 = scmp.ge.s32.totalorder %s1444_s18, 14   ;;  %s1809_s12 = smov %s1386_s13 }
 0x145   : > { %s1810_s13 = smov %s1390_s14  ;;  %s1811_s14 = smov %s1455_s21 }
 0x146   : > { %s1812_s15 = smov %s1444_s18  ;;  %15 = sbr.rel (!%p13_p3) target bundleno = 3 (0x3), region = 67 }
 0x14d   :  { %988 = vsyncpa [#allocation3], 1 }
 0x14e   :  { %990 = vsyncpa [#allocation3 + $0x1], 1 }

</bundles_post_ra>
